<compile_context>
chip_gen: v5e
topology: v5e:2x2
jax: 0.10.0
libtpu: 0.0.40
codegen_flags: <defaults>
</compile_context>

<pallas_src>
import functools

import jax
import jax.numpy as jnp
from jax.experimental import pallas as pl
from jax.experimental.pallas import tpu as pltpu


def _broadcast_kernel(p_ref, o_ref):
    # p_ref: (1, rt, C)      param slab for this (layer, kv, row-tile) step.
    # o_ref: (1, bt, rt, C)  broadcast output slab for one batch tile.
    # One VMEM read of the params, bt replicated full-line stores; the DMA back
    # to HBM is a single contiguous transfer per grid step.
    o_ref[...] = jnp.broadcast_to(p_ref[...][:, None, :, :], o_ref.shape)


def _largest_divisor_fitting(n, unit_bytes, budget_bytes):
    """Largest divisor d of n with d * unit_bytes <= budget_bytes (>= 1)."""
    for d in range(n, 0, -1):
        if n % d == 0 and d * unit_bytes <= budget_bytes:
            return d
    return 1


def _largest_row_tile(rows, row_bytes, budget_bytes):
    """Largest divisor rt of rows that is (8,128)-legal and fits the budget."""
    for rt in range(rows, 0, -1):
        if rows % rt != 0:
            continue
        if rt * row_bytes > budget_bytes:
            continue
        # Legal block sublane extent: multiple of 8 OR the full dimension.
        if rt % 8 == 0 or rt == rows:
            return rt
    return rows  # no legal smaller tile; vmem_limit_bytes is raised to fit.


def broadcast_prefixes(params, batch_size, *, vmem_tile_budget=6 << 20):
    """params: [L, 2, H, T, D] -> [L, 2, B, H, T, D] via a Pallas broadcast copy."""
    L, two, H, T, D = params.shape
    assert two == 2
    L2 = L * 2
    F = H * T * D
    itemsize = jnp.dtype(params.dtype).itemsize

    # Lane-dense flattening: last dim a multiple of 128 when possible.
    if F % 128 == 0:
        R, C = F // 128, 128
    else:
        # Fallback: full-dim exception on the lane axis (legal, less lane-dense).
        R, C = H * T, D
    p_flat = params.reshape(L2, R, C)

    row_bytes = C * itemsize
    per_batch_bytes = R * row_bytes

    if per_batch_bytes <= vmem_tile_budget:
        rt = R
        bt = _largest_divisor_fitting(batch_size, per_batch_bytes, vmem_tile_budget)
    else:
        # Prefix slab for even one batch element is too big: tile along rows.
        bt = 1
        rt = _largest_row_tile(R, row_bytes, vmem_tile_budget)
    nb = batch_size // bt
    nr = R // rt

    out_tile_bytes = bt * rt * C * itemsize
    in_tile_bytes = rt * C * itemsize
    # Double-buffered in+out tiles plus slack; keep within v5e's smaller default
    # by setting the limit explicitly (never exceeds physical VMEM in practice).
    vmem_limit = max(32 << 20, 2 * (out_tile_bytes + in_tile_bytes) + (1 << 20))

    out = pl.pallas_call(
        _broadcast_kernel,
        out_shape=jax.ShapeDtypeStruct((L2, batch_size, R, C), params.dtype),
        grid_spec=pltpu.PrefetchScalarGridSpec(
            num_scalar_prefetch=0,
            grid=(L2, nr, nb),
            # Param block ignores the (innermost) batch-tile axis -> fetched
            # exactly once per (layer, kv, row-tile), not re-DMA'd per batch tile.
            in_specs=[pl.BlockSpec((1, rt, C), lambda i, r, b: (i, r, 0))],
            out_specs=pl.BlockSpec((1, bt, rt, C), lambda i, r, b: (i, b, r, 0)),
        ),
        compiler_params=pltpu.CompilerParams(
            dimension_semantics=("parallel", "arbitrary", "arbitrary"),
            vmem_limit_bytes=int(vmem_limit),
        ),
        cost_estimate=pl.CostEstimate(
            flops=0,
            transcendentals=0,
            bytes_accessed=int(params.size) * itemsize * (1 + batch_size),
        ),
    )(p_flat)

    return out.reshape(L, 2, batch_size, H, T, D)


@functools.partial(jax.jit, static_argnames=("batch_size", "include_gates"))
def _prefix_forward(params, gates, *, batch_size, include_gates):
    expanded = broadcast_prefixes(params, batch_size)
    L = params.shape[0]
    prefixes = []
    for layer_i in range(L):
        layer_prefix = {
            "key": expanded[layer_i, 0],    # [B, H, T, D]
            "value": expanded[layer_i, 1],  # [B, H, T, D]
        }
        if include_gates:
            layer_prefix["gate"] = gates[layer_i]  # [H]
        prefixes.append(layer_prefix)
    return prefixes


class PrefixWrapperPallas:
    """JAX/Pallas port of PrefixWrapper."""

    def __init__(self, num_tokens, num_layers, num_heads, head_dim,
                 include_gates=False, dtype=jnp.bfloat16, key=None):
        self.num_tokens = num_tokens
        self.num_layers = num_layers
        self.num_heads = num_heads
        self.head_dim = head_dim
        self.include_gates = include_gates
        if key is None:
            key = jax.random.PRNGKey(0)
        # torch.nn.init.normal_(self.params): standard normal init.
        self.params = jax.random.normal(
            key, (num_layers, 2, num_heads, num_tokens, head_dim)
        ).astype(dtype)
        self.gates = None
        if include_gates:
            # torch.nn.init.zeros_(self.gates)
            self.gates = jnp.zeros((num_layers, num_heads), dtype=dtype)

    def forward(self, batch_size):
        # Pallas path: materializes the broadcast (matches torch semantics if a
        # downstream consumer needs contiguous [B,H,T,D] key/value tensors).
        return _prefix_forward(
            self.params, self.gates,
            batch_size=batch_size, include_gates=self.include_gates,
        )

    def forward_views(self, batch_size):
        # Zero-copy path (preferred in production): torch's .expand() is a
        # stride-0 view, so no kernel/HBM traffic is actually needed -- the
        # downstream attention kernel can read the prefix with a constant
        # batch index in its BlockSpec.
        prefixes = []
        for layer_i in range(self.num_layers):
            shape = (batch_size, self.num_heads, self.num_tokens, self.head_dim)
            layer_prefix = {
                "key": jnp.broadcast_to(self.params[layer_i, 0][None], shape),
                "value": jnp.broadcast_to(self.params[layer_i, 1][None], shape),
            }
            if self.include_gates:
                layer_prefix["gate"] = self.gates[layer_i]
            prefixes.append(layer_prefix)
        return prefixes


if __name__ == "__main__":
    # Small shapes consistent with the module.
    num_tokens = 8
    num_layers = 2
    num_heads = 4
    head_dim = 32
    batch_size = 2

    module = PrefixWrapperPallas(
        num_tokens=num_tokens,
        num_layers=num_layers,
        num_heads=num_heads,
        head_dim=head_dim,
        include_gates=True,
        dtype=jnp.bfloat16,
        key=jax.random.PRNGKey(0),
    )

    prefixes = module.forward(batch_size)
    jax.block_until_ready(prefixes)

    # Correctness check against a pure-JAX reference of the PyTorch semantics.
    ok = True
    for layer_i, layer_prefix in enumerate(prefixes):
        ref_key = jnp.broadcast_to(
            module.params[layer_i, 0][None],
            (batch_size, num_heads, num_tokens, head_dim),
        )
        ref_val = jnp.broadcast_to(
            module.params[layer_i, 1][None],
            (batch_size, num_heads, num_tokens, head_dim),
        )
        ok &= bool(jnp.array_equal(layer_prefix["key"], ref_key))
        ok &= bool(jnp.array_equal(layer_prefix["value"], ref_val))
        ok &= layer_prefix["key"].shape == (batch_size, num_heads, num_tokens, head_dim)
        ok &= layer_prefix["key"].dtype == jnp.bfloat16
        ok &= bool(jnp.array_equal(layer_prefix["gate"], module.gates[layer_i]))

    # Also sanity-check the zero-copy view path.
    view_prefixes = module.forward_views(batch_size)
    jax.block_until_ready(view_prefixes)
    for layer_i, layer_prefix in enumerate(view_prefixes):
        ok &= bool(jnp.array_equal(layer_prefix["key"], prefixes[layer_i]["key"]))
        ok &= bool(jnp.array_equal(layer_prefix["value"], prefixes[layer_i]["value"]))

    if ok:
        print("KERNEL_OK")
    else:
        raise SystemExit("mismatch vs reference")
</pallas_src>

<mosaic_0001>
module attributes {stable_mosaic.version = 11 : i64} {
  func.func @_broadcast_kernel(%arg0: i32, %arg1: i32, %arg2: i32, %arg3: memref<1x8x128xbf16, #tpu.memory_space<vmem>>, %arg4: memref<1x2x8x128xbf16, #tpu.memory_space<vmem>>) attributes {dimension_semantics = [#tpu.dimension_semantics<parallel>, #tpu.dimension_semantics<arbitrary>, #tpu.dimension_semantics<arbitrary>], iteration_bounds = array<i64: 4, 1, 1>, scalar_prefetch = 0 : i64, scratch_operands = 0 : i64, tpu.core_type = #tpu.core_type<tc>, window_params = [{transform_indices = @transform_0, window_bounds = array<i64: 1, 8, 128>}, {transform_indices = @transform_1, window_bounds = array<i64: 1, 2, 8, 128>}]} {
    %c0 = arith.constant 0 : index
    %c0_0 = arith.constant 0 : index
    %c0_1 = arith.constant 0 : index
    %0 = vector.load %arg3[%c0, %c0_0, %c0_1] : memref<1x8x128xbf16, #tpu.memory_space<vmem>>, vector<1x8x128xbf16>
    %1 = vector.shape_cast %0 : vector<1x8x128xbf16> to vector<1x1x8x128xbf16>
    %2 = vector.shape_cast %1 : vector<1x1x8x128xbf16> to vector<1x1x8x128xbf16>
    %3 = vector.broadcast %2 : vector<1x1x8x128xbf16> to vector<1x2x8x128xbf16>
    %c0_2 = arith.constant 0 : index
    %c0_3 = arith.constant 0 : index
    %c0_4 = arith.constant 0 : index
    %c0_5 = arith.constant 0 : index
    %4 = vector.load %arg4[%c0_2, %c0_3, %c0_4, %c0_5] : memref<1x2x8x128xbf16, #tpu.memory_space<vmem>>, vector<1x2x8x128xbf16>
    tpu.vector_store %arg4[%c0_2, %c0_3, %c0_4, %c0_5], %3 {strides = array<i32>} : memref<1x2x8x128xbf16, #tpu.memory_space<vmem>>, vector<1x2x8x128xbf16>,
    return
  }
  func.func @transform_0(%arg0: i32, %arg1: i32, %arg2: i32) -> (i32, i32, i32) {
    %c0_i32 = arith.constant 0 : i32
    %c0_i32_0 = arith.constant 0 : i32
    return %arg0, %arg1, %c0_i32 : i32, i32, i32
  }
  func.func @transform_1(%arg0: i32, %arg1: i32, %arg2: i32) -> (i32, i32, i32, i32) {
    %c0_i32 = arith.constant 0 : i32
    %c0_i32_0 = arith.constant 0 : i32
    return %arg0, %arg2, %arg1, %c0_i32 : i32, i32, i32, i32
  }
}

</mosaic_0001>

<bundles_post_ra>
// kernel: _prefix_forward.1
= control target key start
LH: loop header
LB: loop body
LE: loop exit
PB: predicated region body
PF: predicated region fallthrough
CT: control target
= control target key end

     0   :  { %s332_s6 = smov 0   ;;  %s314_s7 = smov 0   ;;  %s343_s0 = inlined_call_operand.vmem [shape: bf16[4,8,128], index: 0, kind: input, shape index: {}]   ;;  %s344_s1 = inlined_call_operand.vmem [shape: bf16[4,2,8,128], index: 1, kind: output, shape index: {}]  }
   0x1   :  { %s318_s8 = smov 0  }
   0x2 LB: > { %s30_s9 = sadd.s32 1, %s316_s7  ;;  %p267_p0 = scmp.ge.s32.totalorder %s320_s8, 1  ;;  %s320_s8 = sphi %s318_s8, %s11_s8   ;;  %s316_s7 = sphi %s314_s7, %s315_s7   ;;  %s312_s6 = sphi %s332_s6, %s345_s6  }
   0x3   : > { %p32_p1 = scmp.ge.s32.totalorder %s30_s9, 4  ;;  %p114_p2 = scmp.lt.s32.totalorder %s320_s8, 5 }
   0x5   : > { %s347_s9 = smov (%p32_p1, %s30_s9), 0  ;;  %p115_p3 = pnand %p267_p0, %p114_p2 }
   0x6   : > { %p143_p4 = scmp.lt.s32.totalorder (!%p115_p3), %s312_s6, 3 }
   0x7   : > { %118 = sbr.rel (%p115_p3) target bundleno = 18 (0x12), region = 24 }
   0xc   : > { %s349_s6 = smov (!%p143_p4, %s312_s6), 3 }
   0xd   : > { %s268_s10 = sshll.u32 %s349_s6, 2  ;;  %s273_s11 = sshll.u32 %s349_s6, 3 }
   0xe   : > { %s149_s14 = scalar_lea.vmem %s343_s0, %s268_s10  ;;  %s161_s17 = scalar_lea.vmem %s344_s1, %s273_s11 }
   0xf   : > { %v163_v0 = vld [vmem:[%s149_s14] sm:$0xf] }
  0x10   : > { %164 = vst [vmem:[%s161_s17] sm:$0xf] %v163_v0 }
  0x11   : > { %165 = vst [vmem:[%s161_s17 + $0x4] sm:$0xf] %v163_v0 }
  0x12 PF: > { %s11_s8 = sadd.s32 1, %s320_s8   ;;  %s345_s6 = smov %s316_s7 }
  0x13   : > { %p8_p5 = scmp.ge.s32.totalorder %s11_s8, 6   ;;  %s315_s7 = smov %s347_s9  }
  0x15   :  { %10 = sbr.rel (!%p8_p5) target bundleno = 2 (0x2), region = 54 }

</bundles_post_ra>
